<compile_context>
chip_gen: v6e
topology: v6e:2x2x1
jax: 0.10.0
libtpu: 0.0.40
codegen_flags: <defaults>
</compile_context>

<pallas_src>
import jax
import jax.numpy as jnp
from jax import lax
from jax.experimental import pallas as pl
from jax.experimental.pallas import tpu as pltpu


def _round_up(a, b):
    return ((a + b - 1) // b) * b


def _pos_encoder_kernel(x_ref, o_ref, *, in_dim, pe_dim):
    # x_ref: (tn, C) f32    o_ref: (tn, C*(1 + 2*K)) f32
    x = x_ref[...]                                            # (tn, C)
    tn = x.shape[0]
    K = pe_dim

    # Frequency scales 2^(k+1), exact, built in-kernel from exponent bits:
    # the f32 bit pattern of 2^e is (127 + e) << 23, so e = k + 1 gives
    # (k + 128) << 23.  Exact powers of two -> emb matches the reference.
    k = lax.broadcasted_iota(jnp.int32, (1, K), 1)            # 0 .. K-1
    scale_k = pltpu.bitcast((k + 128) << 23, jnp.float32)     # (1, K) = 2^(k+1)
    scale_2k = jnp.concatenate([scale_k, scale_k], axis=-1)   # (1, 2K): sin|cos

    # Fused scale + lane-expand: each channel contributes one 2K-lane block
    # [x_c*2^1 .. x_c*2^K | x_c*2^1 .. x_c*2^K]; a single concat builds the
    # full (tn, 2*C*K) emb.  The (1, 2K) scale broadcasts along sublanes for
    # free inside the multiply (no (tn, K) materialization).
    emb = jnp.concatenate(
        [x[:, c:c + 1] * scale_2k for c in range(in_dim)], axis=-1)  # (tn, 2CK)

    # Position-within-channel-block (0..2K-1) at full shape -> one wide sin,
    # one wide cos, one same-shape select.  First K lanes of each 2K block are
    # sin, last K are cos — exactly the reference layout.
    r = lax.broadcasted_iota(jnp.int32, (tn, 2 * K), 1)       # (tn, 2K)
    pos = jnp.concatenate([r] * in_dim, axis=-1)              # (tn, 2CK) int32
    enc = jnp.where(pos < K, jnp.sin(emb), jnp.cos(emb))      # (tn, 2CK)

    # Single full-tile store: [x | enc].
    o_ref[...] = jnp.concatenate([x, enc], axis=-1)


def pos_encoder(x, pe_dim, *, tile_n=256):
    """x: (N, C) float32 -> (N, C + 2*C*pe_dim) float32 (== poc_encoding)."""
    assert x.ndim == 2
    assert 1 <= pe_dim <= 127, "2^(pe_dim) must stay finite in float32"
    N, C = x.shape
    out_dim = C * (1 + 2 * pe_dim)

    # ---- row-tile selection --------------------------------------------------
    # 256 rows amortize the ~0.35us/step pipeline overhead; keep >= 4 grid
    # steps when N allows it so v7x's two TensorCores each get >= 2 steps and
    # the output writeback overlaps compute.  Pallas handles the ragged last
    # block itself (out-of-bounds reads are padding, out-of-bounds writes are
    # dropped), so no wrapper-side pad / slice copies are needed.
    tn = min(tile_n, N)
    if N >= 32:
        tn = min(tn, _round_up(pl.cdiv(N, 4), 8))
    if tn < N:
        tn = max(8, (tn // 8) * 8)          # (8, 128) block-shape constraint

    grid_n = pl.cdiv(N, tn)

    kernel = lambda x_ref, o_ref: _pos_encoder_kernel(
        x_ref, o_ref, in_dim=C, pe_dim=pe_dim)

    return pl.pallas_call(
        kernel,
        out_shape=jax.ShapeDtypeStruct((N, out_dim), jnp.float32),
        grid=(grid_n,),
        in_specs=[pl.BlockSpec((tn, C), lambda i: (i, 0))],
        out_specs=pl.BlockSpec((tn, out_dim), lambda i: (i, 0)),
        compiler_params=pltpu.CompilerParams(
            dimension_semantics=("parallel",)),
    )(x)


def _reference(x, pe_dim):
    # Pure-JAX reference mirroring the PyTorch code exactly.
    N, C = x.shape
    scale = jnp.asarray([2.0 ** (i + 1) for i in range(pe_dim)], jnp.float32)
    emb = x[:, :, None] * scale[None, None, :]                      # (N, C, K)
    enc = jnp.concatenate([jnp.sin(emb), jnp.cos(emb)], axis=-1)    # (N, C, 2K)
    return jnp.concatenate([x, enc.reshape(N, C * 2 * pe_dim)], axis=-1)


if __name__ == "__main__":
    key = jax.random.PRNGKey(0)

    # Primary check: evenly tiled path (grid of 4 blocks of 16 rows).
    N, C, K = 64, 4, 8                          # out_dim = 4 + 4*8*2 = 68
    x = jax.random.normal(key, (N, C), dtype=jnp.float32)
    out = jax.block_until_ready(pos_encoder(x, K))
    ref = _reference(x, K)
    assert out.shape == (N, C + 2 * C * K)
    assert jnp.allclose(out, ref, atol=5e-5, rtol=1e-5), "mismatch vs reference"

    # Secondary check: ragged N (grid = cdiv(50, 16) = 4; the out-of-bounds
    # rows of the last block are dropped by Pallas — no pad / slice copies).
    N2, C2, K2 = 50, 3, 6                       # out_dim = 3 + 3*6*2 = 39
    x2 = jax.random.normal(jax.random.PRNGKey(0), (N2, C2), dtype=jnp.float32)
    out2 = jax.block_until_ready(pos_encoder(x2, K2, tile_n=16))
    ref2 = _reference(x2, K2)
    assert out2.shape == (N2, C2 + 2 * C2 * K2)
    assert jnp.allclose(out2, ref2, atol=5e-5, rtol=1e-5), "mismatch vs reference (ragged)"

    # NOTE: the original PyTorch forward `return tz` references an undefined
    # name (a bug in the source); we return the computed encoding p2, the only
    # sensible interpretation.
    print("KERNEL_OK")
</pallas_src>

<mosaic_0001>
module attributes {stable_mosaic.version = 11 : i64} {
  func.func @_lambda_(%arg0: i32, %arg1: memref<16x4xf32, #tpu.memory_space<vmem>>, %arg2: memref<16x68xf32, #tpu.memory_space<vmem>>) attributes {dimension_semantics = [#tpu.dimension_semantics<parallel>], iteration_bounds = array<i64: 4>, scalar_prefetch = 0 : i64, scratch_operands = 0 : i64, tpu.core_type = #tpu.core_type<tc>, window_params = [{transform_indices = @transform_0, window_bounds = array<i64: 16, 4>}, {transform_indices = @transform_1, window_bounds = array<i64: 16, 68>}]} {
    %c0 = arith.constant 0 : index
    %c0_0 = arith.constant 0 : index
    %0 = vector.load %arg1[%c0, %c0_0] : memref<16x4xf32, #tpu.memory_space<vmem>>, vector<16x4xf32>
    %1 = tpu.iota {dimensions = array<i32: 1>} : vector<1x8xi32>
    %c128_i32 = arith.constant 128 : i32
    %2 = vector.broadcast %c128_i32 : i32 to vector<1x8xi32>
    %3 = arith.addi %1, %2 : vector<1x8xi32>
    %c23_i32 = arith.constant 23 : i32
    %4 = vector.broadcast %c23_i32 : i32 to vector<1x8xi32>
    %5 = arith.shli %3, %4 : vector<1x8xi32>
    %6 = tpu.bitcast %5 : vector<1x8xi32> -> vector<1x8xf32>
    %7 = tpu.concatenate %6, %6 in 1 : vector<1x8xf32>, vector<1x8xf32> -> vector<1x16xf32>
    %8 = vector.extract_strided_slice %0 {offsets = [0, 0], sizes = [16, 1], strides = [1, 1]} : vector<16x4xf32> to vector<16x1xf32>
    %9 = vector.broadcast %8 : vector<16x1xf32> to vector<16x16xf32>
    %10 = vector.broadcast %7 : vector<1x16xf32> to vector<16x16xf32>
    %11 = arith.mulf %9, %10 : vector<16x16xf32>
    %12 = vector.extract_strided_slice %0 {offsets = [0, 1], sizes = [16, 1], strides = [1, 1]} : vector<16x4xf32> to vector<16x1xf32>
    %13 = vector.broadcast %12 : vector<16x1xf32> to vector<16x16xf32>
    %14 = vector.broadcast %7 : vector<1x16xf32> to vector<16x16xf32>
    %15 = arith.mulf %13, %14 : vector<16x16xf32>
    %16 = vector.extract_strided_slice %0 {offsets = [0, 2], sizes = [16, 1], strides = [1, 1]} : vector<16x4xf32> to vector<16x1xf32>
    %17 = vector.broadcast %16 : vector<16x1xf32> to vector<16x16xf32>
    %18 = vector.broadcast %7 : vector<1x16xf32> to vector<16x16xf32>
    %19 = arith.mulf %17, %18 : vector<16x16xf32>
    %20 = vector.extract_strided_slice %0 {offsets = [0, 3], sizes = [16, 1], strides = [1, 1]} : vector<16x4xf32> to vector<16x1xf32>
    %21 = vector.broadcast %20 : vector<16x1xf32> to vector<16x16xf32>
    %22 = vector.broadcast %7 : vector<1x16xf32> to vector<16x16xf32>
    %23 = arith.mulf %21, %22 : vector<16x16xf32>
    %24 = tpu.concatenate %11, %15, %19, %23 in 1 : vector<16x16xf32>, vector<16x16xf32>, vector<16x16xf32>, vector<16x16xf32> -> vector<16x64xf32>
    %25 = tpu.iota {dimensions = array<i32: 1>} : vector<16x16xi32>
    %26 = tpu.concatenate %25, %25, %25, %25 in 1 : vector<16x16xi32>, vector<16x16xi32>, vector<16x16xi32>, vector<16x16xi32> -> vector<16x64xi32>
    %c8_i32 = arith.constant 8 : i32
    %27 = vector.broadcast %c8_i32 : i32 to vector<16x64xi32>
    %28 = arith.cmpi slt, %26, %27 : vector<16x64xi32>
    %29 = math.sin %24 : vector<16x64xf32>
    %30 = math.cos %24 : vector<16x64xf32>
    %31 = arith.select %28, %29, %30 : vector<16x64xi1>, vector<16x64xf32>
    %32 = tpu.concatenate %0, %31 in 1 : vector<16x4xf32>, vector<16x64xf32> -> vector<16x68xf32>
    %c0_1 = arith.constant 0 : index
    %c0_2 = arith.constant 0 : index
    %33 = vector.load %arg2[%c0_1, %c0_2] : memref<16x68xf32, #tpu.memory_space<vmem>>, vector<16x68xf32>
    tpu.vector_store %arg2[%c0_1, %c0_2], %32 {strides = array<i32>} : memref<16x68xf32, #tpu.memory_space<vmem>>, vector<16x68xf32>,
    return
  }
  func.func @transform_0(%arg0: i32) -> (i32, i32) {
    %c0_i32 = arith.constant 0 : i32
    %c0_i32_0 = arith.constant 0 : i32
    return %arg0, %c0_i32 : i32, i32
  }
  func.func @transform_1(%arg0: i32) -> (i32, i32) {
    %c0_i32 = arith.constant 0 : i32
    %c0_i32_0 = arith.constant 0 : i32
    return %arg0, %c0_i32 : i32, i32
  }
}

</mosaic_0001>

<bundles_post_ra>
// kernel: tpu_custom_call.1
= control target key start
LH: loop header
LB: loop body
LE: loop exit
PB: predicated region body
PF: predicated region fallthrough
CT: control target
= control target key end

     0   :  { %6 = vsyncpa [#allocation3], 0  ;;  %s1121_s0 = inlined_call_operand.vmem [shape: f32[64,4], index: 0, kind: input, shape index: {}]   ;;  %s1122_s1 = inlined_call_operand.hbm [shape: f32[64,68], index: 1, kind: output, shape index: {}]  }
   0x1   :  { %8 = vsyncpa [#allocation3 + $0x1], 0  ;;  %s919_s6 = smov 0   ;;  %s921_s7 = smov 0  }
   0x2   :  { %s923_s8 = smov 0   ;;  %s925_s9 = smov 0  }
   0x3 LB: > { %s940_s10 = sadd.s32 4294967295, %s890_s9   ;;  %s725_s11 = sadd.s32 4294967294, %s890_s9   ;;  %s890_s9 = sphi %s925_s9, %s1128_s9   ;;  %s886_s8 = sphi %s923_s8, %s1127_s8   ;;  %s882_s7 = sphi %s921_s7, %s1126_s7   ;;  %s878_s6 = sphi %s919_s6, %s1125_s6  }
   0x4   : > { %s944_s12 = sadd.s32 1, %s890_s9   ;;  %s47_s13 = sadd.s32 1, %s886_s8 }
   0x5   : > { %s44_s14 = ssub.s32 %s890_s9, %s944_s12  ;;  %p57_p0 = scmp.ne.s32.totalorder %s886_s8, %s882_s7 }
   0x6   : > { %p45_p1 = scmp.eq.s32.totalorder %s44_s14, 0  ;;  %p58_p2 = scmp.eq.s32.totalorder %s940_s10, 3 }
   0x7   : > { %p63_p3 = scmp.ne.s32.totalorder %s882_s7, %s878_s6  ;;  %p64_p4 = scmp.eq.s32.totalorder %s725_s11, 3 }
   0x8   : > { %s955_s15 = scalar_select %p45_p1, %s886_s8, %s47_s13  }
   0x9   : > { %p957_p5 = por %p58_p2, %p57_p0  ;;  %p961_p6 = por %p64_p4, %p63_p3 }
   0xa   : > { %p728_p7 = scmp.ge.s32.totalorder %s890_s9, 1  ;;  %p91_p8 = scmp.lt.s32.totalorder %s890_s9, 5 }
   0xc   : > { %p92_p9 = pnand %p728_p7, %p91_p8 }
   0xd   : > { %s730_s18 = sshll.u32 (!%p92_p9), %s940_s10, 1  ;;  %s895_s23 = smov (!%p92_p9), 8  }
   0xe   : > { %95 = sbr.rel (%p92_p9) target bundleno = 507 (0x1fb), region = 24  ;;  %p112_p10 = scmp.lt.s32.totalorder (!%p92_p9), %s730_s18, 7 }
   0xf   : > { %s897_s24 = smov (!%p92_p9), 16   ;;  %s898_s25 = smov (!%p92_p9), 32  }
  0x10   : > { %s899_s26 = smov (!%p92_p9), 48   ;;  %s906_s27 = smov (!%p92_p9), 4  }
  0x11   : > { %s108_s28 = sand.u32 (!%p92_p9), 1, %s882_s7   ;;  %s753_s3 = sshll.u32 (!%p92_p9), %s940_s10, 8 }
  0x12   : > { %s729_s29 = sshll.u32 (!%p92_p9), %s108_s28, 4  ;;  %s1077_s11 = scalar_lea.hbm (!%p92_p9), %s1122_s1, %s753_s3 }
  0x13   : > { %v120_v0 = vlaneseq  ;;  %v892_v1 = vmov 2   ;;  %v893_v2 = vmov 1   ;;  %s1130_s18 = smov (!%p112_p10, %s730_s18), 7  ;;  %v894_v8 = vmov 3   ;;  %s110_s30 = scalar_lea.vmem [#allocation2], %s729_s29 }
  0x14   : > { %818 = vset.pattern.permute.xlu1 %v892_v1  ;;  %817 = vset.pattern.permute.xlu0 %v893_v2  ;;  %s731_s19 = sshll.u32 %s1130_s18, 3  ;;  %v896_v9 = vmov 0   ;;  %vm128_vm0 = vcmask 64512   ;;  %vm200_vm1 = vcmask 130048   ;;  %vm203_vm2 = vcmask 261120   ;;  %s663_s2 = sshll.u32 %s110_s30, 4  ;;  %s1072_s2 = int_to_ptr.vmem [resolvable:$true] %s663_s2 }
  0x15   : > { %v968_v3 = vand.u32 127, %v120_v0  ;;  %s115_s22 = scalar_lea.vmem %s1121_s0, %s731_s19  ;;  %v141_v11 = vshrl.u32 %v120_v0, 7  ;;  %vm206_vm3 = vcmask 392192   ;;  %s1080_s13 = scalar_lea.sflag [#allocation3], %s108_s28 }
  0x16   : > { %v973_v4 = vld [vmem:[%s115_s22] sm:$0xff]  ;;  %v978_v6 = vld [vmem:[%s115_s22 + $0x8] sm:$0xff]  ;;  %s830_s14 = scalar_lea.vmem %s1072_s2, 256  ;;  %s907_s10 = smov [#allocation2]  }
  0x17   : > { %157 = vperm.xlu1 %818, %v973_v4   ;;  %147 = vperm.xlu0 %817, %v973_v4   ;;  %v122_v5 = vadd.s32 128, %v968_v3  ;;  %v142_v14 = vsub.s32 0, %v141_v11  ;;  %v901_v11 = vmov 2475754826   ;;  %p831_p11 = scmp.ne.s32.totalorder %s1072_s2, %s830_s14  ;;  %s834_s18 = sshll.u32 %s907_s10, 4  ;;  %s835_s18 = int_to_ptr.vmem [resolvable:$false] %s834_s18 }
  0x18   : > { %s836_s19 = scalar_lea.vmem %s835_s18, 512  ;;  %p837_p0 = scmp.lt.s32.totalorder %s1072_s2, %s835_s18 }
  0x19   : > { %v123_v7 = vshll.u32 %v122_v5, 23  ;;  %p832_p12 = pnand %p831_p11, %p957_p5  ;;  %p838_p1 = scmp.lt.s32.totalorder %s836_s19, %s830_s14 }
  0x1b   : > { %161 = vperm.xlu1 %818, %v978_v6   ;;  %151 = vperm.xlu0 %817, %v978_v6   ;;  %p833_p13 = pneg %p832_p12  ;;  %p839_p2 = por %p838_p1, %p837_p0 }
  0x1d   : > { %p840_p3 = pnand %p839_p2, %p833_p13 }
  0x1f   : > { %819 = vset.pattern.permute.xlu1 %v894_v8  ;;  %125 = vrot.lane.b32.xlu0 %v123_v7, %s895_s23 }
  0x20   : > { %167 = vperm.xlu1 %819, %v973_v4   ;;  %820 = vset.pattern.permute.xlu0 %v894_v8 }
  0x23   : > { %171 = vperm.xlu0 %820, %v978_v6  }
  0x24   : > { %821 = vset.pattern.permute.xlu1 %v896_v9 }
  0x25   : > { %132 = vperm.xlu1 %821, %v973_v4  }
  0x29   : > { %137 = vperm.xlu1 %821, %v978_v6  }
  0x92   : > { %v148_v10 = vpop.permute.xlu0 %147  ;;  %v158_v13 = vpop.permute.xlu1 %157 }
  0x96   : > { %v152_v12 = vpop.permute.xlu0 %151  ;;  %v162_v18 = vpop.permute.xlu1 %161 }
  0x9a   : > { %v126_v15 = vpop.permute.xlu0 %125 }
  0x9b   : > { %v129_v16 = vsel %vm128_vm0, %v123_v7, %v126_v15  ;;  %v168_v23 = vpop.permute.xlu1 %167  ;;  %v900_v7 = vmov 683565275   ;;  %v903_v15 = vmov 2102212464  }
  0x9c   : > { %v143_v17 = vrot.slane %v129_v16, %v142_v14 }
  0x9e   : > { %v155_v19 = vmul.f32 %v152_v12, %v143_v17  ;;  %v154_v20 = vmul.f32 %v148_v10, %v143_v17  ;;  %v165_v21 = vmul.f32 %v162_v18, %v143_v17  ;;  %v164_v22 = vmul.f32 %v158_v13, %v143_v17  ;;  %v172_v24 = vpop.permute.xlu0 %171 }
  0x9f   : > { %v174_v25 = vmul.f32 %v168_v23, %v143_v17  ;;  %v175_v26 = vmul.f32 %v172_v24, %v143_v17  ;;  %v902_v13 = vmov 2131351028   ;;  %v905_v24 = vmov 1326507024  }
  0xa0   : > { %180 = vrot.lane.b32.xlu1 %v155_v19, %s897_s24  ;;  %178 = vrot.lane.b32.xlu0 %v154_v20, %s897_s24  ;;  %v133_v27 = vpop.permute.xlu1 %132 }
  0xa1   : > { %v144_v33 = vmul.f32 %v143_v17, %v133_v27 }
  0xa4   : > { %188 = vrot.lane.b32.xlu1 %v165_v21, %s898_s25  ;;  %186 = vrot.lane.b32.xlu0 %v164_v22, %s898_s25  ;;  %v138_v28 = vpop.permute.xlu1 %137 }
  0xa5   : > { %v145_v34 = vmul.f32 %v143_v17, %v138_v28  ;;  %v904_v17 = vmov 920167782  }
  0xa8   : > { %194 = vrot.lane.b32.xlu0 %v174_v25, %s899_s26  ;;  %196 = vrot.lane.b32.xlu1 %v175_v26, %s899_s26 }
  0xac   : > { %209 = vrot.lane.b32.xlu0 %v968_v3, %s897_s24  ;;  %211 = vrot.lane.b32.xlu1 %v968_v3, %s898_s25 }
  0xb0   : > { %213 = vrot.lane.b32.xlu0 %v968_v3, %s899_s26 }
 0x112   : > { %v181_v29 = vpop.permute.xlu1 %180  ;;  %v179_v30 = vpop.permute.xlu0 %178 }
 0x113   : > { %v202_v35 = vsel %vm200_vm1, %v145_v34, %v181_v29  ;;  %v201_v36 = vsel %vm200_vm1, %v144_v33, %v179_v30 }
 0x116   : > { %v189_v31 = vpop.permute.xlu1 %188  ;;  %v187_v32 = vpop.permute.xlu0 %186 }
 0x117   : > { %v205_v37 = vsel %vm203_vm2, %v202_v35, %v189_v31  ;;  %v204_v38 = vsel %vm203_vm2, %v201_v36, %v187_v32 }
 0x11a   : > { %v197_v39 = vpop.permute.xlu1 %196  ;;  %v195_v40 = vpop.permute.xlu0 %194 }
 0x11b   : > { %v995_v41 = vsel %vm206_vm3, %v205_v37, %v197_v39  ;;  %v998_v42 = vsel %vm206_vm3, %v204_v38, %v195_v40 }
 0x11c   : > { %v323_v43 = vand.u32 2147483647, %v995_v41  ;;  %v326_v44 = vand.u32 2139095040, %v995_v41  ;;  %v222_v45 = vand.u32 2139095040, %v998_v42  ;;  %v219_v50 = vand.u32 2147483647, %v998_v42 }
 0x11e   : > { %v327_v46 = vshrl.u32 %v326_v44, 23  ;;  %v210_v47 = vpop.permute.xlu0 %209  ;;  %v212_v48 = vpop.permute.xlu1 %211  ;;  %v330_v49 = vand.u32 8388607, %v323_v43  ;;  %v223_v51 = vshrl.u32 %v222_v45, 23  ;;  %v1011_v59 = vand.u32 8388607, %v219_v50 }
 0x11f   : > { %v215_v52 = vsel %vm200_vm1, %v968_v3, %v210_v47 }
 0x120   : > { %v736_v53 = vadd.s32 4294967169, %v327_v46  ;;  %v216_v54 = vsel %vm203_vm2, %v215_v52, %v212_v48  ;;  %v732_v55 = vadd.s32 4294967169, %v223_v51  ;;  %v331_v58 = vor.u32 8388608, %v330_v49 }
 0x121   : > { %v227_v3 = vor.u32 8388608, %v1011_v59  ;;  %vm325_vm2 = vcmp.lt.s32.totalorder %v995_v41, 0 }
 0x122   : > { %v333_v56 = vadd.s32 1, %v736_v53  ;;  %v214_v57 = vpop.permute.xlu0 %213  ;;  %v229_v60 = vadd.s32 1, %v732_v55  ;;  %v1016_v2 = vshll.u32 %v331_v58, 8 }
 0x123   : > { %v1014_v61 = vsel %vm206_vm3, %v216_v54, %v214_v57  ;;  %vm324_vm3 = vcmp.le.f32.partialorder %v323_v43, 0.7853982 }
 0x124   : > { %vm334_vm4 = vcmp.gt.s32.totalorder %v333_v56, 0  ;;  %vm230_vm5 = vcmp.gt.s32.totalorder %v229_v60, 0 }
 0x125   : > { %v335_v62 = vsel %vm334_vm4, %v333_v56, 0  ;;  %v231_v1 = vsel %vm230_vm5, %v229_v60, 0  ;;  %vm221_vm4 = vcmp.lt.s32.totalorder %v998_v42, 0  ;;  %vm220_vm5 = vcmp.le.f32.partialorder %v219_v50, 0.7853982 }
 0x126   : > { %v336_v63 = vshrl.u32 %v335_v62, 5  ;;  %v337_v0 = vand.u32 31, %v335_v62  ;;  %v1019_v9 = vshrl.u32 %v231_v1, 5  ;;  %v233_v10 = vand.u32 31, %v231_v1 }
 0x127   : > { %v267_v1 = vshll.u32 %v227_v3, 8 }
 0x128   : > { %v338_v5 = vsub.s32 32, %v337_v0  ;;  %v340_v8 = vshll.u32 %v900_v7, %v337_v0  ;;  %v343_v12 = vshll.u32 %v901_v11, %v337_v0  ;;  %v346_v14 = vshll.u32 %v902_v13, %v337_v0 }
 0x129   : > { %v349_v16 = vshll.u32 %v903_v15, %v337_v0  ;;  %v352_v18 = vshll.u32 %v904_v17, %v337_v0  ;;  %vm355_vm6 = vcmp.lt.s32.totalorder %v336_v63, 1  ;;  %vm356_vm7 = vcmp.lt.s32.totalorder %v336_v63, 2 }
 0x12a   : > { %v341_v19 = vshrl.u32 %v901_v11, %v338_v5  ;;  %v344_v20 = vshrl.u32 %v902_v13, %v338_v5  ;;  %v347_v21 = vshrl.u32 %v903_v15, %v338_v5  ;;  %v339_v22 = vshrl.u32 %v900_v7, %v338_v5 }
 0x12b   : > { %v350_v23 = vshrl.u32 %v904_v17, %v338_v5  ;;  %v353_v25 = vshrl.u32 %v905_v24, %v338_v5  ;;  %v234_v29 = vsub.s32 32, %v233_v10  ;;  %vm357_vm8 = vcmp.lt.s32.totalorder %v336_v63, 3 }
 0x12c   : > { %v342_v26 = vor.u32 %v341_v19, %v340_v8  ;;  %v345_v27 = vor.u32 %v344_v20, %v343_v12  ;;  %v348_v28 = vor.u32 %v347_v21, %v346_v14  ;;  %vm358_vm9 = vcmp.lt.s32.totalorder %v336_v63, 4 }
 0x12d   : > { %v351_v30 = vor.u32 %v350_v23, %v349_v16  ;;  %v354_v31 = vor.u32 %v353_v25, %v352_v18  ;;  %v236_v39 = vshll.u32 %v900_v7, %v233_v10  ;;  %v237_v45 = vshrl.u32 %v901_v11, %v234_v29 }
 0x12e   : > { %v359_v32 = vsel %vm355_vm6, %v339_v22, %v342_v26  ;;  %v360_v33 = vsel %vm358_vm9, %v348_v28, 2102212464  ;;  %v363_v34 = vsel %vm355_vm6, %v342_v26, %v345_v27  ;;  %v367_v35 = vsel %vm355_vm6, %v345_v27, %v348_v28 }
 0x12f   : > { %v361_v36 = vsel %vm357_vm8, %v345_v27, %v360_v33  ;;  %v364_v37 = vsel %vm358_vm9, %v351_v30, 920167782  ;;  %v368_v38 = vsel %vm358_vm9, %v354_v31, 1326507024  ;;  %v239_v46 = vshll.u32 %v901_v11, %v233_v10 }
 0x130   : > { %v365_v40 = vsel %vm357_vm8, %v348_v28, %v364_v37  ;;  %v369_v44 = vsel %vm357_vm8, %v351_v30, %v368_v38  ;;  %v362_v47 = vsel %vm356_vm7, %v359_v32, %v361_v36  ;;  %v240_v51 = vshrl.u32 %v902_v13, %v234_v29 }
 0x131   : > { %v366_v48 = vsel %vm356_vm7, %v363_v34, %v365_v40  ;;  %v370_v49 = vsel %vm356_vm7, %v367_v35, %v369_v44  ;;  %v238_v56 = vor.u32 %v237_v45, %v236_v39  ;;  %v242_v58 = vshll.u32 %v902_v13, %v233_v10 }
 0x132   : > { %v1028_v52 = vmul.u32.u64.low %v1016_v2, %v370_v49  ;;  %v1029_v53 = vmul.u32.u64.high %v1016_v2, %v370_v49, %v1028_v52  ;;  %v1032_v54 = vmul.u32.u64.low %v1016_v2, %v366_v48  ;;  %v1033_v55 = vmul.u32.u64.high %v1016_v2, %v366_v48, %v1032_v54 }
 0x133   : > { %v241_v57 = vor.u32 %v240_v51, %v239_v46  ;;  %v243_v59 = vshrl.u32 %v903_v15, %v234_v29  ;;  %v245_v60 = vshll.u32 %v903_v15, %v233_v10  ;;  %v246_v62 = vshrl.u32 %v904_v17, %v234_v29 }
 0x134   : > { %v249_v0 = vshrl.u32 %v905_v24, %v234_v29  ;;  %v378_v63 = vmul.u32 %v1016_v2, %v362_v47  ;;  %v235_v5 = vshrl.u32 %v900_v7, %v234_v29  ;;  %v248_v11 = vshll.u32 %v904_v17, %v233_v10 }
 0x135   : > { %v244_v8 = vor.u32 %v243_v59, %v242_v58  ;;  %vm380_vm10 = vc.u32 %v1029_v53, %v1032_v54  ;;  %v381_v12 = vadd.s32 1, %v1033_v55  ;;  %v247_v14 = vor.u32 %v246_v62, %v245_v60 }
 0x136   : > { %vm251_vm11 = vcmp.lt.s32.totalorder %v1019_v9, 1  ;;  %v250_v16 = vor.u32 %v249_v0, %v248_v11  ;;  %vm253_vm12 = vcmp.lt.s32.totalorder %v1019_v9, 3  ;;  %vm254_vm13 = vcmp.lt.s32.totalorder %v1019_v9, 4 }
 0x137   : > { %v259_v13 = vsel %vm251_vm11, %v238_v56, %v241_v57  ;;  %v382_v3 = vsel %vm380_vm10, %v381_v12, %v1033_v55  ;;  %v256_v15 = vsel %vm254_vm13, %v244_v8, 2102212464  ;;  %v260_v2 = vsel %vm254_vm13, %v247_v14, 920167782 }
 0x138   : > { %v263_v7 = vsel %vm251_vm11, %v241_v57, %v244_v8  ;;  %v383_v18 = vadd.s32 %v382_v3, %v378_v63  ;;  %vm252_vm14 = vcmp.lt.s32.totalorder %v1019_v9, 2  ;;  %v261_v10 = vsel %vm253_vm12, %v244_v8, %v260_v2 }
 0x139   : > { %v264_v17 = vsel %vm254_vm13, %v250_v16, 1326507024  ;;  %v255_v19 = vsel %vm251_vm11, %v235_v5, %v238_v56  ;;  %v257_v20 = vsel %vm253_vm12, %v241_v57, %v256_v15  ;;  %v262_v21 = vsel %vm252_vm14, %v259_v13, %v261_v10 }
 0x13a   : > { %v265_v22 = vsel %vm253_vm12, %v247_v14, %v264_v17  ;;  %v384_v23 = vadd.s32 536870912, %v383_v18  ;;  %v1043_v25 = vmul.u32.u64.low %v267_v1, %v262_v21  ;;  %v1044_v26 = vmul.u32.u64.high %v267_v1, %v262_v21, %v1043_v25 }
 0x13b   : > { %v266_v24 = vsel %vm252_vm14, %v263_v7, %v265_v22  ;;  %v258_v30 = vsel %vm252_vm14, %v255_v19, %v257_v20  ;;  %v379_v49 = vadd.s32 %v1032_v54, %v1029_v53  ;;  %vm415_vm12 = vweird.f32 %v995_v41 }
 0x13c   : > { %v1046_v27 = vmul.u32.u64.low %v267_v1, %v266_v24  ;;  %v1047_v28 = vmul.u32.u64.high %v267_v1, %v266_v24, %v1046_v27  ;;  %v385_v29 = vshrl.u32 %v384_v23, 30  ;;  %v277_v32 = vadd.s32 1, %v1044_v26 }
 0x13d   : > { %v274_v9 = vmul.u32 %v267_v1, %v258_v30  ;;  %vm218_vm13 = vcmp.lt.s32.totalorder %v1014_v61, 8 }
 0x13e   : > { %v386_v31 = vshll.u32 %v385_v29, 30  ;;  %vm276_vm15 = vc.u32 %v1047_v28, %v1043_v25  ;;  %v275_v11 = vadd.s32 %v1043_v25, %v1047_v28  ;;  %v409_v15 = vsub.s32 4, %v385_v29 }
 0x13f   : > { %v278_v34 = vsel %vm276_vm15, %v277_v32, %v1044_v26 }
 0x140   : > { %v387_v33 = vsub.s32 %v383_v18, %v386_v31  ;;  %v279_v35 = vadd.s32 %v278_v34, %v274_v9  ;;  %v410_v19 = vsel %vm325_vm2, %v409_v15, %v385_v29 }
 0x141   : > { %v412_v23 = vsel %vm324_vm3, 0, %v410_v19 }
 0x142   : > { %v389_v36 = vsub.s32 0, %v387_v33  ;;  %v280_v37 = vadd.s32 536870912, %v279_v35  ;;  %v416_v26 = vadd.s32 3, %v412_v23  ;;  %v623_v30 = vand.u32 3, %v412_v23 }
 0x144   : > { %v737_v38 = vmin.u32 %v389_v36, %v387_v33  ;;  %v281_v39 = vshrl.u32 %v280_v37, 30  ;;  %v417_v29 = vand.u32 3, %v416_v26  ;;  %vm625_vm7 = vcmp.eq.s32.totalorder %v623_v30, 0 }
 0x145   : > { %vm628_vm8 = vcmp.eq.s32.totalorder %v623_v30, 2  ;;  %vm624_vm11 = vcmp.lt.s32.totalorder %v623_v30, 2 }
 0x146   : > { %v391_v40 = vclz %v737_v38  ;;  %v282_v44 = vshll.u32 %v281_v39, 30  ;;  %v305_v25 = vsub.s32 4, %v281_v39  ;;  %vm422_vm6 = vcmp.eq.s32.totalorder %v417_v29, 2 }
 0x147   : > { %vm419_vm9 = vcmp.eq.s32.totalorder %v417_v29, 0  ;;  %vm418_vm10 = vcmp.lt.s32.totalorder %v417_v29, 2 }
 0x148   : > { %v738_v45 = vadd.s32 4294967294, %v391_v40  ;;  %v283_v46 = vsub.s32 %v279_v35, %v282_v44  ;;  %v306_v28 = vsel %vm221_vm4, %v305_v25, %v281_v39 }
 0x149   : > { %v308_v32 = vsel %vm220_vm5, 0, %v306_v28 }
 0x14a   : > { %vm739_vm0 = vcmp.lt.s32.totalorder %v738_v45, 0  ;;  %v285_v48 = vsub.s32 0, %v283_v46  ;;  %v312_v35 = vadd.s32 3, %v308_v32 }
 0x14b   : > { %v394_v47 = vsel %vm739_vm0, 0, %v738_v45 }
 0x14c   : > { %v395_v51 = vsub.s32 32, %v394_v47  ;;  %v399_v52 = vsub.s32 4294967266, %v394_v47  ;;  %v733_v55 = vmin.u32 %v285_v48, %v283_v46  ;;  %v396_v56 = vshll.u32 %v387_v33, %v394_v47 }
 0x14d   : > { %v313_v47 = vand.u32 3, %v312_v35  ;;  %v520_v48 = vand.u32 3, %v308_v32 }
 0x14e   : > { %v397_v57 = vshrl.u32 %v379_v49, %v395_v51  ;;  %v400_v58 = vadd.s32 127, %v399_v52  ;;  %v287_v59 = vclz %v733_v55 }
 0x14f   : > { %vm318_vm14 = vcmp.eq.s32.totalorder %v313_v47, 2  ;;  %vm525_vm15 = vcmp.eq.s32.totalorder %v520_v48, 2  ;;  %vm315_vm0 = vcmp.eq.s32.totalorder %v313_v47, 0 }
 0x150   : > { %v398_v60 = vor.u32 %v397_v57, %v396_v56  ;;  %v401_v62 = vshll.u32 %v400_v58, 23  ;;  %v734_v0 = vadd.s32 4294967294, %v287_v59 }
 0x152   : > { %v402_v1 = vor.u32 4788187, %v401_v62  ;;  %vm735_vm1 = vcmp.lt.s32.totalorder %v734_v0, 0  ;;  %v405_v5 = vcvt.s32.f32 %v398_v60 }
 0x153   : > { %v290_v8 = vsel %vm735_vm1, 0, %v734_v0  ;;  %vm522_vm1 = vcmp.eq.s32.totalorder %v520_v48, 0 }
 0x154   : > { %v403_v63 = vand.u32 2147483647, %v402_v1  ;;  %v291_v12 = vsub.s32 32, %v290_v8  ;;  %v295_v14 = vsub.s32 4294967266, %v290_v8  ;;  %v292_v54 = vshll.u32 %v283_v46, %v290_v8 }
 0x156   : > { %v406_v53 = vmul.f32 %v405_v5, %v403_v63  ;;  %v293_v16 = vshrl.u32 %v275_v11, %v291_v12  ;;  %v296_v13 = vadd.s32 127, %v295_v14 }
 0x158   : > { %v407_v3 = vxor.u32 2147483648, %v406_v53  ;;  %v294_v2 = vor.u32 %v293_v16, %v292_v54  ;;  %v297_v7 = vshll.u32 %v296_v13, 23 }
 0x15a   : > { %v408_v18 = vsel %vm325_vm2, %v407_v3, %v406_v53  ;;  %v298_v17 = vor.u32 4788187, %v297_v7  ;;  %v301_v21 = vcvt.s32.f32 %v294_v2  ;;  %vm314_vm2 = vcmp.lt.s32.totalorder %v313_v47, 2 }
 0x15b   : > { %v411_v10 = vsel %vm324_vm3, %v995_v41, %v408_v18  ;;  %vm521_vm3 = vcmp.lt.s32.totalorder %v520_v48, 2 }
 0x15c   : > { %822 = vcosq.f32 %v411_v10  ;;  %v299_v20 = vand.u32 2147483647, %v298_v17 }
 0x15d   : > { %824 = vsinq.f32 %v411_v10 }
 0x15e   : > { %v302_v22 = vmul.f32 %v301_v21, %v299_v20 }
 0x160   : > { %v303_v24 = vxor.u32 2147483648, %v302_v22 }
 0x162   : > { %v304_v43 = vsel %vm221_vm4, %v303_v24, %v302_v22  ;;  %vm311_vm4 = vweird.f32 %v998_v42 }
 0x163   : > { %v307_v27 = vsel %vm220_vm5, %v998_v42, %v304_v43  ;;  %vm643_vm5 = vcmask 31744  }
 0x164   : > { %826 = vcosq.f32 %v307_v27 }
 0x165   : > { %828 = vsinq.f32 %v307_v27 }
 0x169   : > { %v823_v31 = vpop.eup %822 }
 0x16a   : > { %v825_v9 = vpop.eup %824  ;;  %v423_v33 = vxor.u32 2147483648, %v823_v31 }
 0x16b   : > { %v420_v34 = vxor.u32 2147483648, %v825_v9 }
 0x16c   : > { %v424_v36 = vsel %vm422_vm6, %v423_v33, %v825_v9  ;;  %v630_v50 = vsel %vm628_vm8, %v423_v33, %v825_v9  ;;  %vm646_vm6 = vcmask 556032  }
 0x16d   : > { %v421_v37 = vsel %vm419_vm9, %v823_v31, %v420_v34  ;;  %v627_v38 = vsel %vm625_vm7, %v823_v31, %v420_v34 }
 0x16e   : > { %v425_v39 = vsel %vm418_vm10, %v421_v37, %v424_v36  ;;  %v631_v40 = vsel %vm624_vm11, %v627_v38, %v630_v50 }
 0x16f   : > { %v426_v44 = vsel %vm415_vm12, nan, %v425_v39  ;;  %v632_v45 = vsel %vm415_vm12, nan, %v631_v40 }
 0x170   : > { %v634_v46 = vsel %vm218_vm13, %v426_v44, %v632_v45 }
 0x171   : > { %639 = vrot.lane.b32.xlu0 %v634_v46, %s906_s27  ;;  %v827_v49 = vpop.eup %826 }
 0x172   : > { %v829_v51 = vpop.eup %828  ;;  %v319_v52 = vxor.u32 2147483648, %v827_v49 }
 0x173   : > { %v316_v55 = vxor.u32 2147483648, %v829_v51 }
 0x174   : > { %v320_v41 = vsel %vm318_vm14, %v319_v52, %v829_v51  ;;  %v527_v56 = vsel %vm525_vm15, %v319_v52, %v829_v51 }
 0x175   : > { %v317_v57 = vsel %vm315_vm0, %v827_v49, %v316_v55  ;;  %v524_v58 = vsel %vm522_vm1, %v827_v49, %v316_v55 }
 0x176   : > { %v321_v59 = vsel %vm314_vm2, %v317_v57, %v320_v41  ;;  %v528_v60 = vsel %vm521_vm3, %v524_v58, %v527_v56 }
 0x177   : > { %v322_v62 = vsel %vm311_vm4, nan, %v321_v59  ;;  %v529_v0 = vsel %vm311_vm4, nan, %v528_v60 }
 0x178   : > { %v633_v1 = vsel %vm218_vm13, %v322_v62, %v529_v0 }
 0x179   : > { %637 = vrot.lane.b32.xlu1 %v633_v1, %s906_s27 }
 0x1e3   : > { %v640_v63 = vpop.permute.xlu0 %639 }
 0x1e4   : > { %v645_v5 = vsel %vm643_vm5, %v978_v6, %v640_v63 }
 0x1e5   : > { %648 = vst.msk [vmem:[%s110_s30 + $0x8] sm:$0xff] %vm646_vm6, %v645_v5 }
 0x1eb   : > { %v638_v42 = vpop.permute.xlu1 %637 }
 0x1ec   : > { %v644_v61 = vsel %vm643_vm5, %v973_v4, %v638_v42 }
 0x1ed   : > { %647 = vst.msk [vmem:[%s110_s30] sm:$0xff] %vm646_vm6, %v644_v61 }
 0x1ee   : > { %843 = shalt.err (!%p840_p3)
}
 0x1ef   : > { %s844_s20 = scalar_lea.hbm %s1077_s11, 256  ;;  %s848_s24 = scalar_lea.hbm %s1122_s1, 1024 }
 0x1f0   : > { %p845_p4 = scmp.ne.s32.totalorder %s1077_s11, %s844_s20  ;;  %p849_p9 = scmp.lt.s32.totalorder %s1077_s11, %s1122_s1 }
 0x1f1   : > { %p850_p10 = scmp.lt.s32.totalorder %s848_s24, %s844_s20 }
 0x1f2   : > { %p846_p7 = pnand %p845_p4, %p957_p5 }
 0x1f3   : > { %p851_p11 = por %p850_p10, %p849_p9 }
 0x1f4   : > { %p847_p8 = pneg %p846_p7 }
 0x1f6   : > { %p852_p12 = pnand %p851_p11, %p847_p8 }
 0x1f8   : > { %855 = shalt.err (!%p852_p12)
}
 0x1f9   : > { %s908_s27 = smov 128  }
 0x1fa   : > { %762 = dma.vmem_to_hbm [thread:$0]  (%p957_p5), %s1072_s2, 256, %s1077_s11, %s1080_s13, %s908_s27, %s908_s27, %s895_s23  }
 0x1fb PF: > { %p768_p13 = scmp.ge.s32.totalorder %s890_s9, 2  ;;  %s678_s28 = sand.u32 1, %s878_s6  }
 0x1fc   : > { %s679_s29 = scalar_lea.sflag [#allocation3], %s678_s28 }
 0x1fd   : > { %p765_p0 = pnand %p768_p13, %p961_p6 }
 0x1ff   : > { %p766_p1 = pneg %p765_p0 }
 0x201   : > { %873 = dma.done.wait (%p766_p1), %s679_s29, 256  }
 0x202   : > { %875 = vsyncadd (%p766_p1), %s679_s29, 4294967040  ;;  %p11_p2 = scmp.ge.s32.totalorder %s944_s12, 6   ;;  %s1125_s6 = smov %s882_s7 }
 0x203   : > { %s1126_s7 = smov %s886_s8  ;;  %s1127_s8 = smov %s955_s15 }
 0x204   : > { %s1128_s9 = smov %s944_s12  ;;  %13 = sbr.rel (!%p11_p2) target bundleno = 3 (0x3), region = 59 }
 0x209   :  { %684 = vsyncpa [#allocation3], 1 }
 0x20a   :  { %686 = vsyncpa [#allocation3 + $0x1], 1 }

</bundles_post_ra>
